<compile_context>
chip_gen: v5e
topology: v5e:2x2
jax: 0.10.0
libtpu: 0.0.40
codegen_flags: <defaults>
</compile_context>

<pallas_src>
import math
import functools

import jax
import jax.numpy as jnp
from jax import lax
from jax.experimental import pallas as pl
from jax.experimental.pallas import tpu as pltpu


# ----------------------------------------------------------------------------
# helpers
# ----------------------------------------------------------------------------
def _pick_row_tile(m, target=512):
    """Largest multiple-of-8 divisor of m that is <= target (else m).
    For typical m (a multiple of 8) this never falls back to the full m."""
    t = min(target, m)
    t -= t % 8
    while t >= 8:
        if m % t == 0:
            return t
        t -= 8
    return m


def _pick_lane_tile(d, target=128):
    """Largest multiple-of-128 divisor of d that is <= target (else full d)."""
    t = (min(target, d) // 128) * 128
    while t >= 128:
        if d % t == 0:
            return t
        t -= 128
    return d


def _pick_l_chunk(l, target=64):
    """Scan chunk length: multiple of 8, <= target, divides l, and leaves at
    least two chunks when possible so the cross-chunk carry path pipelines."""
    cap = min(target, l // 2) if l >= 16 else l
    cap -= cap % 8
    t = cap
    while t >= 8:
        if l % t == 0:
            return t
        t -= 8
    return l


def _softplus(x):
    return jnp.where(x > 20.0, x, jnp.log1p(jnp.exp(jnp.minimum(x, 20.0))))


# ----------------------------------------------------------------------------
# Kernel A: fused ln_1 (pre-LN of VSSBlock) + in_proj (single (C, 2*Di) matmul)
# ----------------------------------------------------------------------------
def _ln_inproj_kernel(x_ref, g_ref, b_ref, w_ref, xo_ref, zo_ref, *, d_inner):
    eps = 1e-6
    x = x_ref[...]                                            # (tm, C) f32
    mu = jnp.mean(x, axis=-1, keepdims=True)
    var = jnp.mean(jnp.square(x - mu), axis=-1, keepdims=True)
    xn = (x - mu) * lax.rsqrt(var + eps)
    xn = (xn * g_ref[...] + b_ref[...]).astype(jnp.bfloat16)  # bf16 MXU operand
    xz = jnp.dot(xn, w_ref[...], preferred_element_type=jnp.float32)
    xo_ref[...] = xz[:, :d_inner].astype(xo_ref.dtype)
    zo_ref[...] = xz[:, d_inner:].astype(zo_ref.dtype)


def pallas_ln_inproj(x, g, b, wxz):
    M, C = x.shape
    Di2 = wxz.shape[1]
    Di = Di2 // 2
    tm = _pick_row_tile(M, 512)
    kernel = functools.partial(_ln_inproj_kernel, d_inner=Di)
    return pl.pallas_call(
        kernel,
        out_shape=(jax.ShapeDtypeStruct((M, Di), jnp.bfloat16),
                   jax.ShapeDtypeStruct((M, Di), jnp.bfloat16)),
        grid=(M // tm,),
        in_specs=[
            pl.BlockSpec((tm, C), lambda i: (i, 0)),
            pl.BlockSpec((1, C), lambda i: (0, 0)),
            pl.BlockSpec((1, C), lambda i: (0, 0)),
            pl.BlockSpec((C, Di2), lambda i: (0, 0)),
        ],
        out_specs=(pl.BlockSpec((tm, Di), lambda i: (i, 0)),
                   pl.BlockSpec((tm, Di), lambda i: (i, 0))),
        compiler_params=pltpu.CompilerParams(dimension_semantics=("parallel",)),
    )(x, g, b, wxz)


# ----------------------------------------------------------------------------
# Kernel B: depthwise 3x3 conv (pad=1, groups=d_inner) + bias + SiLU
# Channel-tiled grid, zero padding done in-kernel (no host-side jnp.pad).
# ----------------------------------------------------------------------------
_PADL = 8  # left pad of the conv scratch = one full sublane tile (aligned store)


def _dwconv_silu_kernel(x_ref, w_ref, b_ref, o_ref, xpad):
    H, W, tD = o_ref.shape[1], o_ref.shape[2], o_ref.shape[3]
    # In-kernel zero padding: the image is stored at sublane offset _PADL so the
    # interior store is tile-aligned; the 3x3 taps read at sublane offsets
    # _PADL-1.._PADL+1 (unaligned reads are supported and cheap).
    xpad[...] = jnp.zeros(xpad.shape, xpad.dtype)
    xpad[1:H + 1, _PADL:_PADL + W, :] = x_ref[0].astype(jnp.float32)
    acc = jnp.zeros((H, W, tD), jnp.float32)
    # TODO(synk): replace the shifted loads with pltpu.roll along W (XLU slot)
    #             and tile over output rows (1-row halo) for very large H*W.
    for ky in range(3):
        for kx in range(3):
            c0 = _PADL + kx - 1
            acc = acc + (xpad[ky:ky + H, c0:c0 + W, :]
                         * w_ref[ky, kx, :][None, None, :])
    acc = acc + b_ref[...]                                    # (1, tD) broadcast
    o_ref[0] = (acc * jax.nn.sigmoid(acc)).astype(o_ref.dtype)  # SiLU


def pallas_dwconv_silu(x, w, b):
    B, H, W, D = x.shape
    tD = _pick_lane_tile(D, 128)
    return pl.pallas_call(
        _dwconv_silu_kernel,
        out_shape=jax.ShapeDtypeStruct((B, H, W, D), jnp.bfloat16),
        grid=(B, D // tD),
        in_specs=[
            pl.BlockSpec((1, H, W, tD), lambda i, d: (i, 0, 0, d)),
            pl.BlockSpec((3, 3, tD), lambda i, d: (0, 0, d)),
            pl.BlockSpec((1, tD), lambda i, d: (0, d)),
        ],
        out_specs=pl.BlockSpec((1, H, W, tD), lambda i, d: (i, 0, 0, d)),
        scratch_shapes=[pltpu.VMEM((H + 2, W + _PADL + 1, tD), jnp.float32)],
        compiler_params=pltpu.CompilerParams(
            dimension_semantics=("parallel", "parallel"),
            vmem_limit_bytes=48 * 1024 * 1024),
    )(x, w, b)


# ----------------------------------------------------------------------------
# Kernel C: fused (x_proj+dt_proj) matmul + selective scan, CHUNKED over L.
# Grid = (orientation, batch, L-chunk).  For each chunk, the FORWARD chain
# (params k=o) consumes chunk c and the BACKWARD chain (params k=o+2) consumes
# the mirrored chunk NC-1-c (scanned in reverse inside the chunk), so no
# flipped copies of the sequence are ever materialised.  dA = exp(delta*A) is
# precomputed vectorised, leaving the serial loop as pure multiply-add.
# State layout: h is (d_state, d_inner) -> d_inner on the lane axis.
# ----------------------------------------------------------------------------
def _ss2d_scan_kernel(xf_ref, xb_ref, wc_ref, dtb_ref, a_ref, dsk_ref,
                      yf_ref, yb_ref,
                      da_f, da_b, hb_f, hb_b, c_f, c_b, hcar,
                      *, d_state, d_inner, unroll):
    N, D = d_state, d_inner
    Lc = xf_ref.shape[2]

    @pl.when(pl.program_id(2) == 0)
    def _():                                       # new (o, b) sweep -> reset h
        hcar[...] = jnp.zeros(hcar.shape, hcar.dtype)

    def prepass(x_ref, j, da_r, hb_r, c_r):
        xb16 = x_ref[0, 0]                                    # (Lc, D) bf16
        x = xb16.astype(jnp.float32)
        # folded x_proj + dt_proj: one lane-dense bf16 MXU matmul
        xdbl = jnp.dot(xb16, wc_ref[0, j], preferred_element_type=jnp.float32)
        delta = _softplus(xdbl[:, :D] + dtb_ref[0, j])        # (Lc, D)
        c_r[...] = xdbl[:, D + N:D + 2 * N]                   # (Lc, N)
        # dA hoisted out of the serial recurrence (EUP off the critical path)
        da_r[...] = jnp.exp(delta[:, None, :] * a_ref[0, j][None, :, :])
        # dBu[l, n, :] = delta[l,:] * u[l,:] * B[l,n]
        hb_r[...] = (delta * x)[:, None, :] * xdbl[:, D:D + N][:, :, None]
        return x

    x_f = prepass(xf_ref, 0, da_f, hb_f, c_f)
    x_b = prepass(xb_ref, 1, da_b, hb_b, c_b)

    # serial recurrence: two chains (fwd + bwd) per step, multiply-add only
    def step(t, carry):
        h_f, h_b = carry
        tb = Lc - 1 - t
        h_f = da_f[t] * h_f + hb_f[t]
        h_b = da_b[tb] * h_b + hb_b[tb]
        hb_f[t] = h_f                                         # overwrite in place
        hb_b[tb] = h_b
        return (h_f, h_b)

    h_f, h_b = lax.fori_loop(0, Lc, step, (hcar[0], hcar[1]), unroll=unroll)
    hcar[0] = h_f                                             # carry to next chunk
    hcar[1] = h_b

    # y[l] = sum_n C[l,n]*h[l,n,:] + D_skip * u[l]   (vectorised over the chunk)
    yf = jnp.sum(hb_f[...] * c_f[...][:, :, None], axis=1) + x_f * dsk_ref[0, 0]
    yb = jnp.sum(hb_b[...] * c_b[...][:, :, None], axis=1) + x_b * dsk_ref[0, 1]
    yf_ref[0, 0] = yf.astype(yf_ref.dtype)
    yb_ref[0, 0] = yb.astype(yb_ref.dtype)


def pallas_ss2d_scan(xs_or, wc, dtb, A, Dsk, *, d_state):
    B, O, L, D = xs_or.shape                                  # O == 2 orientations
    Dc = wc.shape[-1]
    N = d_state
    Lc = _pick_l_chunk(L, 64)
    NC = L // Lc
    kernel = functools.partial(_ss2d_scan_kernel, d_state=N, d_inner=D, unroll=4)
    out_sd = jax.ShapeDtypeStruct((B, O, L, D), jnp.bfloat16)
    return pl.pallas_call(
        kernel,
        out_shape=(out_sd, out_sd),
        grid=(O, B, NC),          # orientation outermost -> weights stay resident
        in_specs=[
            pl.BlockSpec((1, 1, Lc, D), lambda o, b, c: (b, o, c, 0)),
            pl.BlockSpec((1, 1, Lc, D), lambda o, b, c: (b, o, NC - 1 - c, 0)),
            pl.BlockSpec((1, 2, D, Dc), lambda o, b, c: (o, 0, 0, 0)),
            pl.BlockSpec((1, 2, 1, D), lambda o, b, c: (o, 0, 0, 0)),
            pl.BlockSpec((1, 2, N, D), lambda o, b, c: (o, 0, 0, 0)),
            pl.BlockSpec((1, 2, 1, D), lambda o, b, c: (o, 0, 0, 0)),
        ],
        out_specs=(pl.BlockSpec((1, 1, Lc, D), lambda o, b, c: (b, o, c, 0)),
                   pl.BlockSpec((1, 1, Lc, D),
                                lambda o, b, c: (b, o, NC - 1 - c, 0))),
        scratch_shapes=[
            pltpu.VMEM((Lc, N, D), jnp.float32),              # dA   (fwd)
            pltpu.VMEM((Lc, N, D), jnp.float32),              # dA   (bwd)
            pltpu.VMEM((Lc, N, D), jnp.float32),              # dBu->h (fwd)
            pltpu.VMEM((Lc, N, D), jnp.float32),              # dBu->h (bwd)
            pltpu.VMEM((Lc, N), jnp.float32),                 # C    (fwd)
            pltpu.VMEM((Lc, N), jnp.float32),                 # C    (bwd)
            pltpu.VMEM((2, N, D), jnp.float32),               # h carry across chunks
        ],
        compiler_params=pltpu.CompilerParams(
            dimension_semantics=("parallel", "parallel", "arbitrary"),
            vmem_limit_bytes=48 * 1024 * 1024),
    )(xs_or, xs_or, wc, dtb, A, Dsk)


# ----------------------------------------------------------------------------
# Kernel D: 4-way y combine + out_norm (LayerNorm) + SiLU(z) gate + out_proj
#           + residual, with the residual buffer aliased to the output.
# ----------------------------------------------------------------------------
def _ln_gate_outproj_kernel(yf_ref, yb_ref, ywh_ref, z_ref, res_ref,
                            g_ref, b_ref, w_ref, o_ref):
    eps = 1e-5
    y = (yf_ref[0, 0].astype(jnp.float32)
         + yb_ref[0, 0].astype(jnp.float32)
         + ywh_ref[0].astype(jnp.float32))                    # (tl, Di)
    mu = jnp.mean(y, axis=-1, keepdims=True)
    var = jnp.mean(jnp.square(y - mu), axis=-1, keepdims=True)
    yn = (y - mu) * lax.rsqrt(var + eps)
    yn = yn * g_ref[...] + b_ref[...]
    z = z_ref[0].astype(jnp.float32)
    yg = (yn * (z * jax.nn.sigmoid(z))).astype(jnp.bfloat16)
    o_ref[0] = res_ref[0] + jnp.dot(yg, w_ref[...],
                                    preferred_element_type=jnp.float32)


def pallas_ln_gate_outproj(y_f, y_b, y_wh_t, z, res, g, b, w):
    B, O, L, Di = y_f.shape
    C = w.shape[1]
    tl = _pick_row_tile(L, 256)
    return pl.pallas_call(
        _ln_gate_outproj_kernel,
        out_shape=jax.ShapeDtypeStruct((B, L, C), jnp.float32),
        grid=(B, L // tl),
        in_specs=[
            pl.BlockSpec((1, 1, tl, Di), lambda i, j: (i, 0, j, 0)),
            pl.BlockSpec((1, 1, tl, Di), lambda i, j: (i, 0, j, 0)),
            pl.BlockSpec((1, tl, Di), lambda i, j: (i, j, 0)),
            pl.BlockSpec((1, tl, Di), lambda i, j: (i, j, 0)),
            pl.BlockSpec((1, tl, C), lambda i, j: (i, j, 0)),
            pl.BlockSpec((1, Di), lambda i, j: (0, 0)),
            pl.BlockSpec((1, Di), lambda i, j: (0, 0)),
            pl.BlockSpec((Di, C), lambda i, j: (0, 0)),
        ],
        out_specs=pl.BlockSpec((1, tl, C), lambda i, j: (i, j, 0)),
        input_output_aliases={4: 0},              # residual buffer -> output
        compiler_params=pltpu.CompilerParams(
            dimension_semantics=("parallel", "parallel")),
    )(y_f, y_b, y_wh_t, z, res, g, b, w)


# ----------------------------------------------------------------------------
# VSSBlock / VSSLayer forward
# ----------------------------------------------------------------------------
def vss_block_forward(x, p):
    """x: (B, H, W, d_model)  ->  x + SS2D(LN(x))   (drop_path/dropout = id)."""
    B, H, W, C = x.shape
    Di = p["d_inner"]
    L = H * W

    xr = x.reshape(B, L, C)                                   # residual (f32)

    # ---- ln_1 + fused in_proj  ->  x_in, z  (bf16 activations)
    x_in, z = pallas_ln_inproj(xr.reshape(B * L, C),
                               p["ln1_g"], p["ln1_b"], p["wxz"])
    z = z.reshape(B, L, Di)

    # ---- depthwise conv 3x3 + bias + SiLU (in-kernel zero padding)
    xc = pallas_dwconv_silu(x_in.reshape(B, H, W, Di), p["conv_w"], p["conv_b"])

    # ---- two scan orientations (h-major / w-major); the fwd+bwd directions of
    #      each are handled inside the scan kernel (mirrored chunk indexing).
    # TODO(synk): build the w-major view inside the scan kernel to drop this
    #             host-side bf16 transpose + stack.
    x_hw = xc.reshape(B, L, Di)                               # l = h*W + w
    x_wh = jnp.transpose(xc, (0, 2, 1, 3)).reshape(B, L, Di)  # l = w*H + h
    xs_or = jnp.stack([x_hw, x_wh], axis=1)                   # (B, 2, L, Di) bf16

    y_f, y_b = pallas_ss2d_scan(xs_or, p["wc"], p["dtb"], p["A"], p["Dsk"],
                                d_state=p["d_state"])         # 2x (B, 2, L, Di)

    # un-transpose the w-major orientation back to h-major ordering (bf16)
    y_wh_t = jnp.transpose((y_f[:, 1] + y_b[:, 1]).reshape(B, W, H, Di),
                           (0, 2, 1, 3)).reshape(B, L, Di)

    # ---- y combine + out_norm + SiLU(z) gate + out_proj + residual (fused)
    out = pallas_ln_gate_outproj(y_f, y_b, y_wh_t, z, xr,
                                 p["out_ln_g"], p["out_ln_b"], p["out_w"])
    return out.reshape(B, H, W, C)


def vss_layer_forward(x, block_params):
    # VSSLayer.forward: sequential VSSBlocks; downsample=None; the PWAM fusion
    # and res_gate members are never invoked by the reference forward().
    for p in block_params:
        x = vss_block_forward(x, p)
    return x


# ----------------------------------------------------------------------------
# Deterministic parameters (mirrors SS2D.__init__ shapes) + kernel-ready prep
# ----------------------------------------------------------------------------
def make_block_params(key, d_model, d_state=16, d_conv=3, expand=2,
                      dt_min=0.001, dt_max=0.1):
    d_inner = int(expand * d_model)
    dt_rank = math.ceil(d_model / 16)
    K = 4
    ks = jax.random.split(key, 8)

    in_proj_wT = jax.random.normal(ks[0], (d_model, 2 * d_inner), jnp.float32) * 0.02
    conv_w = jax.random.normal(ks[1], (d_conv, d_conv, d_inner), jnp.float32) * 0.1
    conv_b = jax.random.normal(ks[2], (1, d_inner), jnp.float32) * 0.01

    x_proj_wT = jax.random.normal(
        ks[3], (K, d_inner, dt_rank + 2 * d_state), jnp.float32) * (d_inner ** -0.5)

    dt_init_std = dt_rank ** -0.5
    dt_proj_wT = jax.random.uniform(
        ks[4], (K, dt_rank, d_inner), jnp.float32,
        minval=-dt_init_std, maxval=dt_init_std)
    dt = jnp.exp(jax.random.uniform(ks[5], (K, 1, d_inner), jnp.float32)
                 * (math.log(dt_max) - math.log(dt_min)) + math.log(dt_min))
    dt = jnp.maximum(dt, 1e-4)
    dt_proj_b = dt + jnp.log(-jnp.expm1(-dt))                 # inverse softplus

    A_logs = jnp.broadcast_to(
        jnp.log(jnp.arange(1, d_state + 1, dtype=jnp.float32))[None, None, :],
        (K, d_inner, d_state))
    Ds = jnp.ones((K, 1, d_inner), jnp.float32)

    out_proj_wT = jax.random.normal(ks[6], (d_inner, d_model), jnp.float32) * 0.02

    # ---- derived, kernel-ready tensors ------------------------------------
    # fold dt_proj into x_proj (f32 fold) -> combined (K, D, D + 2N) projection
    w_delta = jnp.einsum('kdr,krm->kdm', x_proj_wT[:, :, :dt_rank], dt_proj_wT)
    wc = jnp.concatenate([w_delta, x_proj_wT[:, :, dt_rank:]], axis=-1)
    # pad the projection width to a multiple of 128 (lane-dense MXU output)
    dc = wc.shape[-1]
    dc_pad = ((dc + 127) // 128) * 128
    if dc_pad != dc:
        wc = jnp.pad(wc, ((0, 0), (0, 0), (0, dc_pad - dc)))

    # A = -exp(A_logs), laid out (K, N, D): d_inner on the lane axis
    A_neg = -jnp.exp(A_logs).transpose(0, 2, 1)

    # regroup k = (0,1,2,3) -> [orientation hw/wh][fwd/bwd]
    def regroup(a):
        return a[jnp.array([[0, 2], [1, 3]])]

    return dict(
        d_model=d_model, d_inner=d_inner, d_state=d_state, dt_rank=dt_rank,
        ln1_g=jnp.ones((1, d_model), jnp.float32),
        ln1_b=jnp.zeros((1, d_model), jnp.float32),
        wxz=in_proj_wT.astype(jnp.bfloat16),          # fused (C, 2*Di) in_proj
        conv_w=conv_w, conv_b=conv_b,
        wc=regroup(wc).astype(jnp.bfloat16),          # (2, 2, D, Dc_pad) bf16
        dtb=regroup(dt_proj_b),                       # (2, 2, 1, D)
        A=regroup(A_neg),                             # (2, 2, N, D)
        Dsk=regroup(Ds),                              # (2, 2, 1, D)
        out_ln_g=jnp.ones((1, d_inner), jnp.float32),
        out_ln_b=jnp.zeros((1, d_inner), jnp.float32),
        out_w=out_proj_wT.astype(jnp.bfloat16),
    )


def make_layer_params(key, d_model, depth, d_state=16):
    keys = jax.random.split(key, depth)
    return [make_block_params(k, d_model, d_state=d_state) for k in keys]


# ----------------------------------------------------------------------------
if __name__ == "__main__":
    B, H, W = 2, 8, 8
    d_model = 32          # -> d_inner = 64, d_state = 16, dt_rank = 2, L = 64
    depth = 2

    key = jax.random.PRNGKey(0)
    k_x, k_p = jax.random.split(key)
    x = jax.random.normal(k_x, (B, H, W, d_model), jnp.float32)
    blocks = make_layer_params(k_p, d_model, depth=depth)

    out = vss_layer_forward(x, blocks)
    out = jax.block_until_ready(out)
    assert out.shape == (B, H, W, d_model)
    assert bool(jnp.all(jnp.isfinite(out)))
    print("KERNEL_OK")
</pallas_src>

<mosaic_0001>
module attributes {stable_mosaic.version = 11 : i64} {
  func.func @_ln_inproj_kernel(%arg0: i32, %arg1: memref<128x32xf32, #tpu.memory_space<vmem>>, %arg2: memref<1x32xf32, #tpu.memory_space<vmem>>, %arg3: memref<1x32xf32, #tpu.memory_space<vmem>>, %arg4: memref<32x128xbf16, #tpu.memory_space<vmem>>, %arg5: memref<128x64xbf16, #tpu.memory_space<vmem>>, %arg6: memref<128x64xbf16, #tpu.memory_space<vmem>>) attributes {dimension_semantics = [#tpu.dimension_semantics<parallel>], iteration_bounds = array<i64: 1>, scalar_prefetch = 0 : i64, scratch_operands = 0 : i64, tpu.core_type = #tpu.core_type<tc>, window_params = [{transform_indices = @transform_0, window_bounds = array<i64: 128, 32>}, {pipeline_mode = #tpu.pipeline_mode<synchronous>, transform_indices = @transform_1, window_bounds = array<i64: 1, 32>}, {pipeline_mode = #tpu.pipeline_mode<synchronous>, transform_indices = @transform_2, window_bounds = array<i64: 1, 32>}, {pipeline_mode = #tpu.pipeline_mode<synchronous>, transform_indices = @transform_3, window_bounds = array<i64: 32, 128>}, {transform_indices = @transform_4, window_bounds = array<i64: 128, 64>}, {transform_indices = @transform_5, window_bounds = array<i64: 128, 64>}]} {
    %c0 = arith.constant 0 : index
    %c0_0 = arith.constant 0 : index
    %0 = vector.load %arg1[%c0, %c0_0] : memref<128x32xf32, #tpu.memory_space<vmem>>, vector<128x32xf32>
    %cst = arith.constant dense<0.000000e+00> : vector<128xf32>
    %1 = vector.multi_reduction <add>, %0, %cst [1] : vector<128x32xf32> to vector<128xf32>
    %2 = vector.shape_cast %1 : vector<128xf32> to vector<128x1xf32>
    %cst_1 = arith.constant 3.200000e+01 : f32
    %3 = vector.broadcast %cst_1 : f32 to vector<128x1xf32>
    %4 = arith.divf %2, %3 : vector<128x1xf32>
    %5 = vector.broadcast %4 : vector<128x1xf32> to vector<128x32xf32>
    %6 = arith.subf %0, %5 : vector<128x32xf32>
    %7 = arith.mulf %6, %6 : vector<128x32xf32>
    %cst_2 = arith.constant dense<0.000000e+00> : vector<128xf32>
    %8 = vector.multi_reduction <add>, %7, %cst_2 [1] : vector<128x32xf32> to vector<128xf32>
    %9 = vector.shape_cast %8 : vector<128xf32> to vector<128x1xf32>
    %cst_3 = arith.constant 3.200000e+01 : f32
    %10 = vector.broadcast %cst_3 : f32 to vector<128x1xf32>
    %11 = arith.divf %9, %10 : vector<128x1xf32>
    %12 = vector.broadcast %4 : vector<128x1xf32> to vector<128x32xf32>
    %13 = arith.subf %0, %12 : vector<128x32xf32>
    %cst_4 = arith.constant 9.99999997E-7 : f32
    %14 = vector.broadcast %cst_4 : f32 to vector<128x1xf32>
    %15 = arith.addf %11, %14 : vector<128x1xf32>
    %16 = math.rsqrt %15 : vector<128x1xf32>
    %17 = vector.broadcast %16 : vector<128x1xf32> to vector<128x32xf32>
    %18 = arith.mulf %13, %17 : vector<128x32xf32>
    %c0_5 = arith.constant 0 : index
    %c0_6 = arith.constant 0 : index
    %19 = vector.load %arg2[%c0_5, %c0_6] : memref<1x32xf32, #tpu.memory_space<vmem>>, vector<1x32xf32>
    %20 = vector.broadcast %19 : vector<1x32xf32> to vector<128x32xf32>
    %21 = arith.mulf %18, %20 : vector<128x32xf32>
    %c0_7 = arith.constant 0 : index
    %c0_8 = arith.constant 0 : index
    %22 = vector.load %arg3[%c0_7, %c0_8] : memref<1x32xf32, #tpu.memory_space<vmem>>, vector<1x32xf32>
    %23 = vector.broadcast %22 : vector<1x32xf32> to vector<128x32xf32>
    %24 = arith.addf %21, %23 : vector<128x32xf32>
    %25 = arith.truncf %24 : vector<128x32xf32> to vector<128x32xbf16>
    %c0_9 = arith.constant 0 : index
    %c0_10 = arith.constant 0 : index
    %26 = vector.load %arg4[%c0_9, %c0_10] : memref<32x128xbf16, #tpu.memory_space<vmem>>, vector<32x128xbf16>
    %cst_11 = arith.constant dense<0.000000e+00> : vector<128x128xf32>
    %27 = tpu.matmul %25, %26, %cst_11 {dimension_numbers = #tpu.dot_dimension_numbers<[1], [0], [0], [1], [0, 0, 1, 1], [], []>} : vector<128x32xbf16>, vector<32x128xbf16>, vector<128x128xf32> -> vector<128x128xf32>
    %28 = vector.extract_strided_slice %27 {offsets = [0, 0], sizes = [128, 64], strides = [1, 1]} : vector<128x128xf32> to vector<128x64xf32>
    %29 = arith.truncf %28 : vector<128x64xf32> to vector<128x64xbf16>
    %c0_12 = arith.constant 0 : index
    %c0_13 = arith.constant 0 : index
    %30 = vector.load %arg5[%c0_12, %c0_13] : memref<128x64xbf16, #tpu.memory_space<vmem>>, vector<128x64xbf16>
    tpu.vector_store %arg5[%c0_12, %c0_13], %29 {strides = array<i32>} : memref<128x64xbf16, #tpu.memory_space<vmem>>, vector<128x64xbf16>,
    %31 = vector.extract_strided_slice %27 {offsets = [0, 64], sizes = [128, 64], strides = [1, 1]} : vector<128x128xf32> to vector<128x64xf32>
    %32 = arith.truncf %31 : vector<128x64xf32> to vector<128x64xbf16>
    %c0_14 = arith.constant 0 : index
    %c0_15 = arith.constant 0 : index
    %33 = vector.load %arg6[%c0_14, %c0_15] : memref<128x64xbf16, #tpu.memory_space<vmem>>, vector<128x64xbf16>
    tpu.vector_store %arg6[%c0_14, %c0_15], %32 {strides = array<i32>} : memref<128x64xbf16, #tpu.memory_space<vmem>>, vector<128x64xbf16>,
    return
  }
  func.func @transform_0(%arg0: i32) -> (i32, i32) {
    %c0_i32 = arith.constant 0 : i32
    %c0_i32_0 = arith.constant 0 : i32
    return %arg0, %c0_i32 : i32, i32
  }
  func.func @transform_1(%arg0: i32) -> (i32, i32) {
    %c0_i32 = arith.constant 0 : i32
    %c0_i32_0 = arith.constant 0 : i32
    %c0_i32_1 = arith.constant 0 : i32
    return %c0_i32, %c0_i32_0 : i32, i32
  }
  func.func @transform_2(%arg0: i32) -> (i32, i32) {
    %c0_i32 = arith.constant 0 : i32
    %c0_i32_0 = arith.constant 0 : i32
    %c0_i32_1 = arith.constant 0 : i32
    return %c0_i32, %c0_i32_0 : i32, i32
  }
  func.func @transform_3(%arg0: i32) -> (i32, i32) {
    %c0_i32 = arith.constant 0 : i32
    %c0_i32_0 = arith.constant 0 : i32
    %c0_i32_1 = arith.constant 0 : i32
    return %c0_i32, %c0_i32_0 : i32, i32
  }
  func.func @transform_4(%arg0: i32) -> (i32, i32) {
    %c0_i32 = arith.constant 0 : i32
    %c0_i32_0 = arith.constant 0 : i32
    return %arg0, %c0_i32 : i32, i32
  }
  func.func @transform_5(%arg0: i32) -> (i32, i32) {
    %c0_i32 = arith.constant 0 : i32
    %c0_i32_0 = arith.constant 0 : i32
    return %arg0, %c0_i32 : i32, i32
  }
}

</mosaic_0001>

<bundles_post_ra>
// kernel: tpu_custom_call.1
= control target key start
LH: loop header
LB: loop body
LE: loop exit
PB: predicated region body
PF: predicated region fallthrough
CT: control target
= control target key end

     0   :  { %vm36_vm0 = vcmask 261120   ;;  %v716_v32 = vmov 32.0   ;;  %s717_s8 = smov 64   ;;  %s1459_s0 = inlined_call_operand.vmem [shape: f32[128,32], index: 0, kind: input, shape index: {}]   ;;  %s1460_s1 = inlined_call_operand.vmem [shape: f32[1,32], index: 1, kind: input, shape index: {}]   ;;  %s1461_s2 = inlined_call_operand.vmem [shape: f32[1,32], index: 2, kind: input, shape index: {}]   ;;  %s1462_s3 = inlined_call_operand.vmem [shape: bf16[32,128], index: 3, kind: input, shape index: {}]   ;;  %s1463_s4 = inlined_call_operand.vmem [shape: bf16[128,64], index: 4, kind: output, shape index: {0}]   ;;  %s1464_s5 = inlined_call_operand.vmem [shape: bf16[128,64], index: 5, kind: output, shape index: {1}]  }
   0x1   :  { %v32_v0 = vld [vmem:[%s1459_s0 + $0x60] sm:$0xff]  ;;  %v766_v6 = vld [vmem:[%s1459_s0 + $0x68] sm:$0xff]  ;;  %v797_v14 = vld [vmem:[%s1459_s0 + $0x50] sm:$0xff]  ;;  %682 = vrcp.f32 %v716_v32 }
   0x2   :  { %v28_v1 = vld [vmem:[%s1459_s0 + $0x40] sm:$0xff]  ;;  %v73_v3 = vsel %vm36_vm0, %v32_v0, 0.0  ;;  %v771_v7 = vld [vmem:[%s1459_s0 + $0x48] sm:$0xff]  ;;  %v76_v9 = vsel %vm36_vm0, %v766_v6, 0.0  ;;  %v67_v17 = vsel %vm36_vm0, %v797_v14, 0.0  ;;  %v808_v18 = vld [vmem:[%s1459_s0 + $0x58] sm:$0xff] }
   0x3   :  { %v757_v2 = vld [vmem:[%s1459_s0] sm:$0xff]  ;;  %v61_v4 = vsel %vm36_vm0, %v28_v1, 0.0  ;;  %74 = vadd.xlane.f32.xlu1 %v73_v3  ;;  %v776_v8 = vld [vmem:[%s1459_s0 + $0x8] sm:$0xff]  ;;  %v64_v10 = vsel %vm36_vm0, %v771_v7, 0.0  ;;  %v813_v19 = vld [vmem:[%s1459_s0 + $0x70] sm:$0xff]  ;;  %v70_v21 = vsel %vm36_vm0, %v808_v18, 0.0 }
   0x4   :  { %v37_v5 = vsel %vm36_vm0, %v757_v2, 0.0  ;;  %62 = vadd.xlane.f32.xlu0 %v61_v4  ;;  %v40_v11 = vsel %vm36_vm0, %v776_v8, 0.0  ;;  %v787_v12 = vld [vmem:[%s1459_s0 + $0x20] sm:$0xff]  ;;  %v792_v13 = vld [vmem:[%s1459_s0 + $0x28] sm:$0xff]  ;;  %v818_v20 = vld [vmem:[%s1459_s0 + $0x78] sm:$0xff]  ;;  %v79_v22 = vsel %vm36_vm0, %v813_v19, 0.0 }
   0x5   :  { %38 = vadd.xlane.f32.xlu2 %v37_v5  ;;  %v49_v15 = vsel %vm36_vm0, %v787_v12, 0.0  ;;  %v52_v16 = vsel %vm36_vm0, %v792_v13, 0.0  ;;  %v82_v23 = vsel %vm36_vm0, %v818_v20, 0.0  ;;  %v829_v24 = vld [vmem:[%s1459_s0 + $0x10] sm:$0xff]  ;;  %v834_v25 = vld [vmem:[%s1459_s0 + $0x18] sm:$0xff] }
   0x6   :  { %v839_v26 = vld [vmem:[%s1459_s0 + $0x30] sm:$0xff]  ;;  %v43_v27 = vsel %vm36_vm0, %v829_v24, 0.0  ;;  %v46_v28 = vsel %vm36_vm0, %v834_v25, 0.0  ;;  %v850_v30 = vld [vmem:[%s1459_s0 + $0x38] sm:$0xff] }
   0x7   :  { %v55_v29 = vsel %vm36_vm0, %v839_v26, 0.0  ;;  %v58_v31 = vsel %vm36_vm0, %v850_v30, 0.0  ;;  %v683_v33 = vpop.eup %682 }
   0x8   :  { %v86_v34 = vmul.f32 32.0, %v683_v33  ;;  %vm90_vm1 = vweird.f32 %v683_v33 }
   0xa   :  { %v87_v35 = vsub.f32 1.0, %v86_v34 }
   0xb   :  { %77 = vadd.xlane.f32.xlu1 %v76_v9 }
   0xc   :  { %65 = vadd.xlane.f32.xlu0 %v64_v10  ;;  %v88_v36 = vmul.f32 %v683_v33, %v87_v35 }
   0xd   :  { %41 = vadd.xlane.f32.xlu2 %v40_v11 }
   0xe   :  { %v89_v37 = vadd.f32 %v683_v33, %v88_v36 }
  0x10   :  { %v854_v38 = vsel %vm90_vm1, %v683_v33, %v89_v37 }
  0x13   :  { %53 = vadd.xlane.f32.xlu1 %v52_v16 }
  0x14   :  { %50 = vadd.xlane.f32.xlu0 %v49_v15 }
  0x15   :  { %68 = vadd.xlane.f32.xlu2 %v67_v17 }
  0x1b   :  { %80 = vadd.xlane.f32.xlu1 %v79_v22 }
  0x1c   :  { %71 = vadd.xlane.f32.xlu0 %v70_v21 }
  0x1d   :  { %83 = vadd.xlane.f32.xlu2 %v82_v23 }
  0x23   :  { %47 = vadd.xlane.f32.xlu1 %v46_v28 }
  0x24   :  { %44 = vadd.xlane.f32.xlu0 %v43_v27 }
  0x25   :  { %56 = vadd.xlane.f32.xlu2 %v55_v29 }
  0x2c   :  { %59 = vadd.xlane.f32.xlu0 %v58_v31 }
  0x76   :  { %v75_v39 = vpop.xlane.xlu1 %74 }
  0x77   :  { %v63_v40 = vpop.xlane.xlu0 %62  ;;  %v104_v41 = vmul.f32 %v854_v38, %v75_v39 }
  0x78   :  { %v100_v42 = vmul.f32 %v854_v38, %v63_v40  ;;  %v39_v43 = vpop.xlane.xlu2 %38 }
  0x79   :  { %v858_v44 = vsub.f32 %v32_v0, %v104_v41  ;;  %v92_v56 = vmul.f32 %v854_v38, %v39_v43 }
  0x7a   :  { %v860_v45 = vsub.f32 %v28_v1, %v100_v42 }
  0x7b   :  { %v136_v47 = vmul.f32 %v858_v44, %v858_v44  ;;  %v888_v63 = vsub.f32 %v757_v2, %v92_v56 }
  0x7c   :  { %v132_v46 = vmul.f32 %v860_v45, %v860_v45 }
  0x7d   :  { %v176_v49 = vsel %vm36_vm0, %v136_v47, 0.0  ;;  %v124_v10 = vmul.f32 %v888_v63, %v888_v63 }
  0x7e   :  { %v164_v48 = vsel %vm36_vm0, %v132_v46, 0.0  ;;  %v78_v50 = vpop.xlane.xlu1 %77  ;;  %177 = vadd.xlane.f32.xlu0 %v176_v49 }
  0x7f   :  { %v66_v51 = vpop.xlane.xlu0 %65  ;;  %165 = vadd.xlane.f32.xlu1 %v164_v48  ;;  %v105_v52 = vmul.f32 %v854_v38, %v78_v50 }
  0x80   :  { %v101_v53 = vmul.f32 %v854_v38, %v66_v51  ;;  %v42_v54 = vpop.xlane.xlu2 %41 }
  0x81   :  { %v93_v55 = vmul.f32 %v854_v38, %v42_v54  ;;  %v873_v57 = vsub.f32 %v766_v6, %v105_v52 }
  0x82   :  { %v876_v58 = vsub.f32 %v771_v7, %v101_v53 }
  0x83   :  { %v879_v59 = vsub.f32 %v776_v8, %v93_v55  ;;  %v137_v60 = vmul.f32 %v873_v57, %v873_v57 }
  0x84   :  { %v133_v61 = vmul.f32 %v876_v58, %v876_v58 }
  0x85   :  { %v125_v62 = vmul.f32 %v879_v59, %v879_v59  ;;  %v179_v0 = vsel %vm36_vm0, %v137_v60, 0.0 }
  0x86   :  { %v167_v1 = vsel %vm36_vm0, %v133_v61, 0.0  ;;  %v54_v5 = vpop.xlane.xlu1 %53 }
  0x87   :  { %v51_v3 = vpop.xlane.xlu0 %50  ;;  %180 = vadd.xlane.f32.xlu1 %v179_v0  ;;  %168 = vadd.xlane.f32.xlu2 %v167_v1  ;;  %v143_v4 = vsel %vm36_vm0, %v125_v62, 0.0  ;;  %v97_v8 = vmul.f32 %v854_v38, %v54_v5 }
  0x88   :  { %v96_v6 = vmul.f32 %v854_v38, %v51_v3  ;;  %144 = vadd.xlane.f32.xlu0 %v143_v4  ;;  %v69_v7 = vpop.xlane.xlu2 %68 }
  0x89   :  { %v102_v9 = vmul.f32 %v854_v38, %v69_v7  ;;  %v905_v15 = vsub.f32 %v792_v13, %v97_v8 }
  0x8a   :  { %v897_v2 = vsub.f32 %v787_v12, %v96_v6  ;;  %v140_v12 = vsel %vm36_vm0, %v124_v10, 0.0 }
  0x8b   :  { %v902_v11 = vsub.f32 %v797_v14, %v102_v9  ;;  %v129_v29 = vmul.f32 %v905_v15, %v905_v15 }
  0x8c   :  { %v128_v16 = vmul.f32 %v897_v2, %v897_v2 }
  0x8d   :  { %v134_v17 = vmul.f32 %v902_v11, %v902_v11  ;;  %v155_v36 = vsel %vm36_vm0, %v129_v29, 0.0 }
  0x8e   :  { %v152_v21 = vsel %vm36_vm0, %v128_v16, 0.0  ;;  %v81_v14 = vpop.xlane.xlu1 %80 }
  0x8f   :  { %v72_v22 = vpop.xlane.xlu0 %71  ;;  %153 = vadd.xlane.f32.xlu1 %v152_v21  ;;  %141 = vadd.xlane.f32.xlu2 %v140_v12  ;;  %v170_v23 = vsel %vm36_vm0, %v134_v17, 0.0  ;;  %v106_v28 = vmul.f32 %v854_v38, %v81_v14  ;;  %v670_v17 = vld [vmem:[%s1462_s3] sm:$0xff] }
  0x90   :  { %v103_v27 = vmul.f32 %v854_v38, %v72_v22  ;;  %171 = vadd.xlane.f32.xlu0 %v170_v23  ;;  %v84_v13 = vpop.xlane.xlu2 %83 }
  0x91   :  { %v107_v31 = vmul.f32 %v854_v38, %v84_v13  ;;  %v926_v34 = vsub.f32 %v813_v19, %v106_v28 }
  0x92   :  { %v920_v32 = vsub.f32 %v808_v18, %v103_v27 }
  0x93   :  { %v923_v33 = vsub.f32 %v818_v20, %v107_v31  ;;  %v138_v43 = vmul.f32 %v926_v34, %v926_v34 }
  0x94   :  { %v135_v35 = vmul.f32 %v920_v32, %v920_v32 }
  0x95   :  { %v139_v37 = vmul.f32 %v923_v33, %v923_v33  ;;  %v182_v51 = vsel %vm36_vm0, %v138_v43, 0.0 }
  0x96   :  { %v173_v39 = vsel %vm36_vm0, %v135_v35, 0.0  ;;  %v48_v20 = vpop.xlane.xlu1 %47 }
  0x97   :  { %174 = vadd.xlane.f32.xlu1 %v173_v39  ;;  %v45_v40 = vpop.xlane.xlu0 %44  ;;  %156 = vadd.xlane.f32.xlu2 %v155_v36  ;;  %v185_v18 = vsel %vm36_vm0, %v139_v37, 0.0  ;;  %v95_v42 = vmul.f32 %v854_v38, %v48_v20 }
  0x98   :  { %v94_v41 = vmul.f32 %v854_v38, %v45_v40  ;;  %186 = vadd.xlane.f32.xlu0 %v185_v18  ;;  %v57_v19 = vpop.xlane.xlu2 %56 }
  0x99   :  { %v98_v46 = vmul.f32 %v854_v38, %v57_v19  ;;  %v947_v49 = vsub.f32 %v834_v25, %v95_v42 }
  0x9a   :  { %v941_v47 = vsub.f32 %v829_v24, %v94_v41 }
  0x9b   :  { %v944_v48 = vsub.f32 %v839_v26, %v98_v46  ;;  %v127_v25 = vmul.f32 %v947_v49, %v947_v49 }
  0x9c   :  { %v126_v50 = vmul.f32 %v941_v47, %v941_v47 }
  0x9d   :  { %v130_v52 = vmul.f32 %v944_v48, %v944_v48  ;;  %v149_v60 = vsel %vm36_vm0, %v127_v25, 0.0 }
  0x9e   :  { %v146_v53 = vsel %vm36_vm0, %v126_v50, 0.0 }
  0x9f   :  { %147 = vadd.xlane.f32.xlu1 %v146_v53  ;;  %v60_v54 = vpop.xlane.xlu0 %59  ;;  %183 = vadd.xlane.f32.xlu2 %v182_v51  ;;  %v158_v24 = vsel %vm36_vm0, %v130_v52, 0.0 }
  0xa0   :  { %v99_v26 = vmul.f32 %v854_v38, %v60_v54  ;;  %159 = vadd.xlane.f32.xlu0 %v158_v24 }
  0xa2   :  { %v960_v55 = vsub.f32 %v850_v30, %v99_v26  ;;  %v671_v30 = vld [vmem:[%s1462_s3 + $0x8] sm:$0xff] }
  0xa3   :  { %673 = vmatpush.bf16.msra.mxu2 %v671_v30  ;;  %674 = vmatpush.bf16.msra.mxu3 %v671_v30 }
  0xa4   :  { %v131_v56 = vmul.f32 %v960_v55, %v960_v55  ;;  %490 = vmatpush.bf16.msra.mxu0 %v671_v30  ;;  %672 = vmatpush.bf16.msra.mxu1 %v671_v30 }
  0xa6   :  { %v161_v61 = vsel %vm36_vm0, %v131_v56, 0.0 }
  0xa7   :  { %162 = vadd.xlane.f32.xlu1 %v161_v61  ;;  %150 = vadd.xlane.f32.xlu2 %v149_v60 }
  0xa8   :  { %676 = vmatpush.bf16.msra.mxu2 %v670_v17  ;;  %677 = vmatpush.bf16.msra.mxu3 %v670_v17 }
  0xa9   :  { %491 = vmatpush.bf16.msra.mxu0 %v670_v17  ;;  %675 = vmatpush.bf16.msra.mxu1 %v670_v17 }
  0xf1   :  { %v178_v0 = vpop.xlane.xlu0 %177 }
  0xf2   :  { %v166_v62 = vpop.xlane.xlu1 %165  ;;  %v200_v3 = vmul.f32 %v178_v0, %v854_v38 }
  0xf3   :  { %v196_v1 = vmul.f32 %v166_v62, %v854_v38 }
  0xf4   :  { %v216_v5 = vadd.f32 1e-06, %v200_v3 }
  0xf5   :  { %v212_v4 = vadd.f32 1e-06, %v196_v1 }
  0xf6   :  { %vm346_vm6 = vweird.f32 %v216_v5 }
  0xf7   :  { %684 = vrsqrt.f32 %v212_v4  ;;  %vm306_vm4 = vweird.f32 %v212_v4 }
  0xf8   :  { %686 = vrsqrt.f32 %v216_v5 }
  0xfa   :  { %v181_v6 = vpop.xlane.xlu1 %180  ;;  %v169_v7 = vpop.xlane.xlu2 %168 }
  0xfb   :  { %v201_v8 = vmul.f32 %v181_v6, %v854_v38  ;;  %v145_v9 = vpop.xlane.xlu0 %144  ;;  %v197_v10 = vmul.f32 %v169_v7, %v854_v38 }
  0xfc   :  { %v189_v16 = vmul.f32 %v145_v9, %v854_v38 }
  0xfd   :  { %v977_v21 = vpop.eup %684  ;;  %v979_v12 = vadd.f32 1e-06, %v201_v8  ;;  %v981_v22 = vadd.f32 1e-06, %v197_v10 }
  0xfe   :  { %v983_v23 = vpop.eup %686  ;;  %v301_v14 = vmul.f32 %v977_v21, %v212_v4  ;;  %v986_v27 = vadd.f32 1e-06, %v189_v16  ;;  %vm307_vm2 = vweird.f32 %v977_v21 }
  0xff   :  { %v341_v13 = vmul.f32 %v983_v23, %v216_v5  ;;  %688 = vrsqrt.f32 %v979_v12  ;;  %vm347_vm3 = vweird.f32 %v983_v23  ;;  %vm1020_vm5 = vmor %vm306_vm4, %vm307_vm2  ;;  %vm356_vm8 = vweird.f32 %v979_v12 }
 0x100   :  { %v302_v28 = vmul.f32 %v977_v21, %v301_v14  ;;  %690 = vrsqrt.f32 %v986_v27  ;;  %vm1027_vm7 = vmor %vm346_vm6, %vm347_vm3  ;;  %vm236_vm9 = vweird.f32 %v986_v27  ;;  %vm316_vm11 = vweird.f32 %v981_v22 }
 0x101   :  { %v342_v29 = vmul.f32 %v983_v23, %v341_v13  ;;  %692 = vrsqrt.f32 %v981_v22 }
 0x102   :  { %v303_v31 = vmul.f32 0.5, %v302_v28  ;;  %v154_v35 = vpop.xlane.xlu1 %153  ;;  %v142_v36 = vpop.xlane.xlu2 %141 }
 0x103   :  { %v343_v37 = vmul.f32 0.5, %v342_v29  ;;  %v192_v39 = vmul.f32 %v154_v35, %v854_v38  ;;  %v172_v40 = vpop.xlane.xlu0 %171  ;;  %v188_v18 = vmul.f32 %v142_v36, %v854_v38 }
 0x104   :  { %v304_v20 = vsub.f32 1.5, %v303_v31  ;;  %v198_v41 = vmul.f32 %v172_v40, %v854_v38  ;;  %v1056_v31 = vld [vmem:[%s1460_s1] ss:$0 sm:$0xff] }
 0x105   :  { %v997_v19 = vpop.eup %688  ;;  %v344_v42 = vsub.f32 1.5, %v343_v37  ;;  %v1000_v43 = vadd.f32 1e-06, %v192_v39  ;;  %v1009_v52 = vadd.f32 1e-06, %v188_v18 }
 0x106   :  { %v1002_v46 = vpop.eup %690  ;;  %v351_v50 = vmul.f32 %v997_v19, %v979_v12  ;;  %v1007_v51 = vadd.f32 1e-06, %v198_v41  ;;  %v305_v54 = vmul.f32 %v977_v21, %v304_v20  ;;  %vm357_vm12 = vweird.f32 %v997_v19 }
 0x107   :  { %v693_v53 = vpop.eup %692  ;;  %v345_v24 = vmul.f32 %v983_v23, %v344_v42  ;;  %v231_v26 = vmul.f32 %v1002_v46, %v986_v27  ;;  %694 = vrsqrt.f32 %v1000_v43  ;;  %vm237_vm14 = vweird.f32 %v1002_v46  ;;  %vm1090_vm2 = vmor %vm356_vm8, %vm357_vm12 }
 0x108   :  { %v352_v25 = vmul.f32 %v997_v19, %v351_v50  ;;  %v311_v56 = vmul.f32 %v693_v53, %v981_v22  ;;  %696 = vrsqrt.f32 %v1007_v51  ;;  %v309_v30 = vsel %vm1020_vm5, %v977_v21, %v305_v54  ;;  %vm1112_vm5 = vmor %vm236_vm9, %vm237_vm14 }
 0x109   :  { %v232_v61 = vmul.f32 %v1002_v46, %v231_v26  ;;  %v349_v5 = vsel %vm1027_vm7, %v983_v23, %v345_v24  ;;  %698 = vrsqrt.f32 %v1009_v52  ;;  %vm317_vm10 = vweird.f32 %v693_v53 }
 0x10a   :  { %v353_v0 = vmul.f32 0.5, %v352_v25  ;;  %v312_v1 = vmul.f32 %v693_v53, %v311_v56  ;;  %v175_v3 = vpop.xlane.xlu1 %174  ;;  %v157_v4 = vpop.xlane.xlu2 %156  ;;  %v388_v13 = vmul.f32 %v309_v30, %v860_v45  ;;  %v392_v28 = vmul.f32 %v349_v5, %v858_v44  ;;  %vm318_vm13 = vmor %vm316_vm11, %vm317_vm10 }
 0x10b   :  { %v187_v6 = vpop.xlane.xlu0 %186  ;;  %v233_v7 = vmul.f32 0.5, %v232_v61  ;;  %v199_v9 = vmul.f32 %v175_v3, %v854_v38  ;;  %v193_v21 = vmul.f32 %v157_v4, %v854_v38  ;;  %vm266_vm15 = vweird.f32 %v1000_v43 }
 0x10c   :  { %v313_v8 = vmul.f32 0.5, %v312_v1  ;;  %v203_v10 = vmul.f32 %v187_v6, %v854_v38  ;;  %v354_v17 = vsub.f32 1.5, %v353_v0  ;;  %vm326_vm1 = vweird.f32 %v1007_v51 }
 0x10d   :  { %v1041_v16 = vpop.eup %694  ;;  %v1051_v29 = vadd.f32 1e-06, %v199_v9  ;;  %v234_v36 = vsub.f32 1.5, %v233_v7  ;;  %v1070_v18 = vadd.f32 1e-06, %v193_v21  ;;  %v408_v25 = vmul.f32 %v1056_v31, %v388_v13 }
 0x10e   :  { %v314_v14 = vsub.f32 1.5, %v313_v8  ;;  %v261_v23 = vmul.f32 %v1041_v16, %v1000_v43  ;;  %v1058_v35 = vpop.eup %696  ;;  %v1061_v40 = vadd.f32 1e-06, %v203_v10  ;;  %v355_v44 = vmul.f32 %v997_v19, %v354_v17 }
 0x10f   :  { %v1063_v45 = vpop.eup %698  ;;  %v321_v22 = vmul.f32 %v1058_v35, %v1007_v51  ;;  %700 = vrsqrt.f32 %v1051_v29  ;;  %v1095_v56 = vmul.f32 %v1002_v46, %v234_v36  ;;  %vm226_vm3 = vweird.f32 %v1009_v52 }
 0x110   :  { %v315_v37 = vmul.f32 %v693_v53, %v314_v14  ;;  %v262_v39 = vmul.f32 %v1041_v16, %v261_v23  ;;  %v221_v42 = vmul.f32 %v1063_v45, %v1009_v52  ;;  %702 = vrsqrt.f32 %v1061_v40 }
 0x111   :  { %v322_v54 = vmul.f32 %v1058_v35, %v321_v22  ;;  %v412_v62 = vmul.f32 %v1056_v31, %v392_v28  ;;  %v359_v12 = vsel %vm1090_vm2, %v997_v19, %v355_v44  ;;  %704 = vrsqrt.f32 %v1070_v18 }
 0x112   :  { %v319_v20 = vsel %vm318_vm13, %v693_v53, %v315_v37  ;;  %v263_v41 = vmul.f32 0.5, %v262_v39  ;;  %v148_v24 = vpop.xlane.xlu1 %147  ;;  %v1084_v53 = vld [vmem:[%s1461_s2] ss:$0 sm:$0xff]  ;;  %v222_v60 = vmul.f32 %v1063_v45, %v221_v42  ;;  %v184_v61 = vpop.xlane.xlu2 %183  ;;  %vm267_vm4 = vweird.f32 %v1041_v16 }
 0x113   :  { %v389_v50 = vmul.f32 %v319_v20, %v876_v58  ;;  %v160_v26 = vpop.xlane.xlu0 %159  ;;  %v323_v1 = vmul.f32 0.5, %v322_v54  ;;  %v190_v4 = vmul.f32 %v148_v24, %v854_v38  ;;  %v202_v6 = vmul.f32 %v184_v61, %v854_v38  ;;  %vm1154_vm9 = vmor %vm266_vm15, %vm267_vm4 }
 0x114   :  { %v264_v0 = vsub.f32 1.5, %v263_v41  ;;  %v223_v3 = vmul.f32 0.5, %v222_v60  ;;  %v194_v30 = vmul.f32 %v160_v26, %v854_v38  ;;  %v428_v8 = vadd.f32 %v1084_v53, %v408_v25 }
 0x115   :  { %v324_v19 = vsub.f32 1.5, %v323_v1  ;;  %v409_v7 = vmul.f32 %v1056_v31, %v389_v50  ;;  %v393_v9 = vmul.f32 %v359_v12, %v873_v57  ;;  %v239_v10 = vsel %vm1112_vm5, %v1002_v46, %v1095_v56  ;;  %v1126_v21 = vpop.eup %700 }
 0x116   :  { %v224_v17 = vsub.f32 1.5, %v223_v3  ;;  %v1124_v27 = vadd.f32 1e-06, %v190_v4  ;;  %v1129_v14 = vmul.f32 %v1041_v16, %v264_v0  ;;  %vm327_vm6 = vweird.f32 %v1058_v35  ;;  %v1135_v57 = vpop.eup %702 }
 0x117   :  { %vm227_vm7 = vweird.f32 %v1063_v45  ;;  %v1133_v23 = vadd.f32 1e-06, %v194_v30  ;;  %v331_v28 = vmul.f32 %v1126_v21, %v1051_v29  ;;  %v1141_v36 = vadd.f32 1e-06, %v202_v6  ;;  %v1143_v37 = vpop.eup %704  ;;  %vm1183_vm14 = vmor %vm326_vm1, %vm327_vm6 }
 0x118   :  { %v225_v13 = vmul.f32 %v1063_v45, %v224_v17  ;;  %706 = vrsqrt.f32 %v1124_v27  ;;  %v325_v39 = vmul.f32 %v1058_v35, %v324_v19  ;;  %vm336_vm8 = vweird.f32 %v1051_v29  ;;  %vm1172_vm12 = vmor %vm226_vm3, %vm227_vm7 }
 0x119   :  { %v371_v44 = vmul.f32 %v1135_v57, %v1061_v40  ;;  %v429_v22 = vadd.f32 %v1084_v53, %v409_v7  ;;  %v332_v41 = vmul.f32 %v1126_v21, %v331_v28  ;;  %vm376_vm10 = vweird.f32 %v1061_v40 }
 0x11a   :  { %v271_v42 = vmul.f32 %v1143_v37, %v1070_v18  ;;  %vm276_vm11 = vweird.f32 %v1070_v18  ;;  %v413_v50 = vmul.f32 %v1056_v31, %v393_v9  ;;  %v269_v43 = vsel %vm1154_vm9, %v1041_v16, %v1129_v14  ;;  %v163_v26 = vpop.xlane.xlu1 %162  ;;  %v151_v60 = vpop.xlane.xlu2 %150 }
 0x11b   :  { %vm337_vm13 = vweird.f32 %v1126_v21  ;;  %v372_v24 = vmul.f32 %v1135_v57, %v371_v44  ;;  %708 = vrsqrt.f32 %v1133_v23  ;;  %v229_v52 = vsel %vm1172_vm12, %v1063_v45, %v225_v13 }
 0x11c   :  { %v333_v25 = vmul.f32 0.5, %v332_v41  ;;  %v272_v58 = vmul.f32 %v1143_v37, %v271_v42  ;;  %710 = vrsqrt.f32 %v1141_v36  ;;  %v329_v61 = vsel %vm1183_vm14, %v1058_v35, %v325_v39  ;;  %vm1213_vm1 = vmor %vm336_vm8, %vm337_vm13 }
 0x11d   :  { %v373_v12 = vmul.f32 0.5, %v372_v24  ;;  %v440_v51 = vpack.c.bf16 %v429_v22, %v428_v8  ;;  %v432_v0 = vadd.f32 %v1084_v53, %v412_v62  ;;  %v433_v45 = vadd.f32 %v1084_v53, %v413_v50 }
 0x11e   :  { %v1196_v1 = vpop.eup %706  ;;  %v334_v3 = vsub.f32 1.5, %v333_v25  ;;  %v273_v4 = vmul.f32 0.5, %v272_v58  ;;  %v195_v30 = vmul.f32 %v163_v26, %v854_v38  ;;  %v380_v19 = vmul.f32 %v229_v52, %v888_v63 }
 0x11f   :  { %v374_v6 = vsub.f32 1.5, %v373_v12  ;;  %v241_v7 = vmul.f32 %v1196_v1, %v1124_v27  ;;  %666 = vmatmul.msk.bf16.vlgmr.msra.gmra.mxu2 %vm36_vm0, %v440_v51  ;;  %v191_v35 = vmul.f32 %v151_v60, %v854_v38  ;;  %vm277_vm15 = vweird.f32 %v1143_v37 }
 0x120   :  { %v335_v62 = vmul.f32 %v1126_v21, %v334_v3  ;;  %v274_v8 = vsub.f32 1.5, %v273_v4  ;;  %v442_v9 = vpack.c.bf16 %v433_v45, %v432_v0  ;;  %vm377_vm2 = vweird.f32 %v1135_v57  ;;  %vm278_vm3 = vmor %vm276_vm11, %vm277_vm15 }
 0x121   :  { %v1207_v17 = vpop.eup %708  ;;  %v375_v14 = vmul.f32 %v1135_v57, %v374_v6  ;;  %v242_v38 = vmul.f32 %v1196_v1, %v241_v7  ;;  %v1220_v13 = vadd.f32 1e-06, %v195_v30  ;;  %v1229_v22 = vadd.f32 1e-06, %v191_v35  ;;  %vm1252_vm4 = vmor %vm376_vm10, %vm377_vm2 }
 0x122   :  { %v711_v28 = vpop.eup %710  ;;  %v339_v39 = vsel %vm1213_vm1, %v1126_v21, %v335_v62  ;;  %v275_v44 = vmul.f32 %v1143_v37, %v274_v8  ;;  %v281_v29 = vmul.f32 %v1207_v17, %v1133_v23  ;;  %668 = vmatmul.msk.bf16.vlgmr.msra.gmra.mxu3 %vm36_vm0, %v442_v9  ;;  %v381_v20 = vmul.f32 %v239_v10, %v879_v59 }
 0x123   :  { %v384_v41 = vmul.f32 %v269_v43, %v897_v2  ;;  %v361_v21 = vmul.f32 %v711_v28, %v1141_v36  ;;  %v400_v42 = vmul.f32 %v1056_v31, %v380_v19  ;;  %v390_v50 = vmul.f32 %v329_v61, %v902_v11 }
 0x124   :  { %v391_v54 = vmul.f32 %v339_v39, %v920_v32  ;;  %v279_v5 = vsel %vm278_vm3, %v1143_v37, %v275_v44  ;;  %v282_v46 = vmul.f32 %v1207_v17, %v281_v29  ;;  %v243_v18 = vmul.f32 0.5, %v242_v38 }
 0x125   :  { %v385_v2 = vmul.f32 %v279_v5, %v905_v15  ;;  %v362_v56 = vmul.f32 %v711_v28, %v361_v21  ;;  %712 = vrsqrt.f32 %v1220_v13  ;;  %v379_v11 = vsel %vm1252_vm4, %v1135_v57, %v375_v14 }
 0x126   :  { %v283_v32 = vmul.f32 0.5, %v282_v46  ;;  %vm286_vm5 = vweird.f32 %v1133_v23  ;;  %714 = vrsqrt.f32 %v1229_v22  ;;  %vm367_vm6 = vweird.f32 %v711_v28 }
 0x127   :  { %v363_v40 = vmul.f32 0.5, %v362_v56  ;;  %v401_v10 = vmul.f32 %v1056_v31, %v381_v20  ;;  %v420_v37 = vadd.f32 %v1084_v53, %v400_v42  ;;  %v404_v43 = vmul.f32 %v1056_v31, %v384_v41 }
 0x128   :  { %v284_v15 = vsub.f32 1.5, %v283_v32  ;;  %v405_v24 = vmul.f32 %v1056_v31, %v385_v2  ;;  %v410_v26 = vmul.f32 %v1056_v31, %v390_v50  ;;  %v244_v16 = vsub.f32 1.5, %v243_v18 }
 0x129   :  { %v364_v57 = vsub.f32 1.5, %v363_v40  ;;  %v421_v52 = vadd.f32 %v1084_v53, %v401_v10  ;;  %v411_v25 = vmul.f32 %v1056_v31, %v391_v54  ;;  %v395_v58 = vmul.f32 %v379_v11, %v923_v33 }
 0x12a   :  { %vm366_vm7 = vweird.f32 %v1141_v36  ;;  %v424_v60 = vadd.f32 %v1084_v53, %v404_v43  ;;  %v425_v61 = vadd.f32 %v1084_v53, %v405_v24  ;;  %vm287_vm8 = vweird.f32 %v1207_v17 }
 0x12b   :  { %v713_v12 = vpop.eup %712  ;;  %v365_v51 = vmul.f32 %v711_v28, %v364_v57  ;;  %v436_v0 = vpack.c.bf16 %v421_v52, %v420_v37  ;;  %v431_v3 = vadd.f32 %v1084_v53, %v411_v25  ;;  %v285_v45 = vmul.f32 %v1207_v17, %v284_v15  ;;  %vm368_vm9 = vmor %vm366_vm7, %vm367_vm6 }
 0x12c   :  { %v715_v4 = vpop.eup %714  ;;  %v291_v33 = vmul.f32 %v713_v12, %v1220_v13  ;;  %v438_v30 = vpack.c.bf16 %v425_v61, %v424_v60  ;;  %v430_v36 = vadd.f32 %v1084_v53, %v410_v26  ;;  %v245_v19 = vmul.f32 %v1196_v1, %v244_v16  ;;  %vm288_vm12 = vmor %vm286_vm5, %vm287_vm8 }
 0x12d   :  { %vm247_vm10 = vweird.f32 %v1196_v1  ;;  %v369_v6 = vsel %vm368_vm9, %v711_v28, %v365_v51  ;;  %v251_v7 = vmul.f32 %v715_v4, %v1229_v22  ;;  %662 = vmatmul.msk.bf16.vlgmr.msra.gmra.mxu0 %vm36_vm0, %v436_v0  ;;  %v415_v9 = vmul.f32 %v1056_v31, %v395_v58 }
 0x12e   :  { %v394_v35 = vmul.f32 %v369_v6, %v926_v34  ;;  %v292_v62 = vmul.f32 %v713_v12, %v291_v33  ;;  %664 = vmatmul.msk.bf16.vlgmr.msra.gmra.mxu1 %vm36_vm0, %v438_v30  ;;  %v441_v8 = vpack.c.bf16 %v431_v3, %v430_v36  ;;  %vm246_vm11 = vweird.f32 %v1124_v27 }
 0x12f   :  { %v252_v63 = vmul.f32 %v715_v4, %v251_v7  ;;  %vm248_vm13 = vmor %vm246_vm11, %vm247_vm10  ;;  %v289_v14 = vsel %vm288_vm12, %v1207_v17, %v285_v45  ;;  %vm297_vm14 = vweird.f32 %v713_v12  ;;  %v435_v29 = vadd.f32 %v1084_v53, %v415_v9 }
 0x130   :  { %v293_v38 = vmul.f32 0.5, %v292_v62  ;;  %667 = vmatmul.msk.bf16.gmra.mxu2 %vm36_vm0, %v441_v8  ;;  %v414_v34 = vmul.f32 %v1056_v31, %v394_v35  ;;  %v249_v28 = vsel %vm248_vm13, %v1196_v1, %v245_v19  ;;  %v386_v23 = vmul.f32 %v289_v14, %v944_v48 }
 0x131   :  { %v253_v39 = vmul.f32 0.5, %v252_v63  ;;  %vm257_vm15 = vweird.f32 %v715_v4  ;;  %v382_v17 = vmul.f32 %v249_v28, %v941_v47  ;;  %vm296_vm1 = vweird.f32 %v1220_v13 }
 0x132   :  { %v294_v44 = vsub.f32 1.5, %v293_v38  ;;  %v434_v27 = vadd.f32 %v1084_v53, %v414_v34  ;;  %vm298_vm2 = vmor %vm296_vm1, %vm297_vm14  ;;  %vm256_vm3 = vweird.f32 %v1229_v22  ;;  %v406_v48 = vmul.f32 %v1056_v31, %v386_v23 }
 0x133   :  { %v254_v20 = vsub.f32 1.5, %v253_v39  ;;  %vm258_vm4 = vmor %vm256_vm3, %vm257_vm15  ;;  %v402_v47 = vmul.f32 %v1056_v31, %v382_v17  ;;  %vm549_vm5 = vcmask 519168  }
 0x134   :  { %v295_v41 = vmul.f32 %v713_v12, %v294_v44  ;;  %v443_v21 = vpack.c.bf16 %v435_v29, %v434_v27  ;;  %v426_v59 = vadd.f32 %v1084_v53, %v406_v48 }
 0x135   :  { %v255_v42 = vmul.f32 %v715_v4, %v254_v20  ;;  %v422_v2 = vadd.f32 %v1084_v53, %v402_v47 }
 0x136   :  { %v299_v1 = vsel %vm298_vm2, %v713_v12, %v295_v41  ;;  %669 = vmatmul.msk.bf16.gmra.mxu3 %vm36_vm0, %v443_v21 }
 0x137   :  { %v387_v50 = vmul.f32 %v299_v1, %v960_v55  ;;  %v259_v54 = vsel %vm258_vm4, %v715_v4, %v255_v42 }
 0x138   :  { %v383_v5 = vmul.f32 %v259_v54, %v947_v49 }
 0x139   :  { %v407_v13 = vmul.f32 %v1056_v31, %v387_v50 }
 0x13a   :  { %v403_v46 = vmul.f32 %v1056_v31, %v383_v5 }
 0x13b   :  { %v427_v22 = vadd.f32 %v1084_v53, %v407_v13 }
 0x13c   :  { %v423_v18 = vadd.f32 %v1084_v53, %v403_v46 }
 0x13d   :  { %v439_v55 = vpack.c.bf16 %v427_v22, %v426_v59 }
 0x13e   :  { %v437_v56 = vpack.c.bf16 %v423_v18, %v422_v2 }
 0x13f   :  { %665 = vmatmul.msk.bf16.gmra.mxu1 %vm36_vm0, %v439_v55 }
 0x140   :  { %663 = vmatmul.msk.bf16.gmra.mxu0 %vm36_vm0, %v437_v56 }
 0x1a2   :  { %v513_v49 = vpop.f32.mrf.mxu2 }
 0x1a3   :  { %v541_v11 = vpack.c.bf16 %v513_v49, %v513_v49 }
 0x1a5   :  { %558 = vst.msk [vmem:[%s1463_s4 + $0x20] sm:$0xf] %vm549_vm5, %v541_v11  ;;  %v523_v31 = vpop.f32.mrf.mxu3 }
 0x1a6   :  { %v545_v32 = vpack.c.bf16 %v523_v31, %v523_v31 }
 0x1a8   :  { %562 = vst.msk [vmem:[%s1463_s4 + $0x30] sm:$0xf] %vm549_vm5, %v545_v32  ;;  %606 = vrot.lane.b32.xlu1 %v545_v32, %s717_s8 }
 0x1aa   :  { %v493_v53 = vpop.f32.mrf.mxu0  ;;  %v515_v40 = vpop.f32.mrf.mxu2 }
 0x1ab   :  { %v533_v10 = vpack.c.bf16 %v493_v53, %v493_v53  ;;  %v542_v37 = vpack.c.bf16 %v515_v40, %v515_v40  ;;  %v503_v15 = vpop.f32.mrf.mxu1 }
 0x1ac   :  { %v537_v43 = vpack.c.bf16 %v503_v15, %v503_v15 }
 0x1ad   :  { %550 = vst.msk [vmem:[%s1463_s4] sm:$0xf] %vm549_vm5, %v533_v10  ;;  %582 = vrot.lane.b32.xlu2 %v533_v10, %s717_s8  ;;  %v525_v24 = vpop.f32.mrf.mxu3 }
 0x1ae   :  { %559 = vst.msk [vmem:[%s1463_s4 + $0x24] sm:$0xf] %vm549_vm5, %v542_v37  ;;  %v546_v26 = vpack.c.bf16 %v525_v24, %v525_v24  ;;  %590 = vrot.lane.b32.xlu0 %v537_v43, %s717_s8 }
 0x1af   :  { %554 = vst.msk [vmem:[%s1463_s4 + $0x10] sm:$0xf] %vm549_vm5, %v537_v43 }
 0x1b0   :  { %563 = vst.msk [vmem:[%s1463_s4 + $0x34] sm:$0xf] %vm549_vm5, %v546_v26  ;;  %600 = vrot.lane.b32.xlu1 %v542_v37, %s717_s8 }
 0x1b2   :  { %v495_v16 = vpop.f32.mrf.mxu0 }
 0x1b3   :  { %v534_v57 = vpack.c.bf16 %v495_v16, %v495_v16  ;;  %v518_v52 = vpop.f32.mrf.mxu2  ;;  %v505_v25 = vpop.f32.mrf.mxu1 }
 0x1b4   :  { %v543_v58 = vpack.c.bf16 %v518_v52, %v518_v52  ;;  %v538_v60 = vpack.c.bf16 %v505_v25, %v505_v25 }
 0x1b5   :  { %551 = vst.msk [vmem:[%s1463_s4 + $0x4] sm:$0xf] %vm549_vm5, %v534_v57  ;;  %598 = vrot.lane.b32.xlu2 %v541_v11, %s717_s8 }
 0x1b6   :  { %560 = vst.msk [vmem:[%s1463_s4 + $0x28] sm:$0xf] %vm549_vm5, %v543_v58  ;;  %584 = vrot.lane.b32.xlu0 %v534_v57, %s717_s8 }
 0x1b7   :  { %555 = vst.msk [vmem:[%s1463_s4 + $0x14] sm:$0xf] %vm549_vm5, %v538_v60 }
 0x1b9   :  { %v528_v61 = vpop.f32.mrf.mxu3 }
 0x1ba   :  { %v547_v12 = vpack.c.bf16 %v528_v61, %v528_v61 }
 0x1bb   :  { %v520_v51 = vpop.f32.mrf.mxu2 }
 0x1bc   :  { %v544_v0 = vpack.c.bf16 %v520_v51, %v520_v51  ;;  %564 = vst.msk [vmem:[%s1463_s4 + $0x38] sm:$0xf] %vm549_vm5, %v547_v12  ;;  %v508_v3 = vpop.f32.mrf.mxu1 }
 0x1bd   :  { %592 = vrot.lane.b32.xlu2 %v538_v60, %s717_s8  ;;  %v498_v4 = vpop.f32.mrf.mxu0  ;;  %v539_v45 = vpack.c.bf16 %v508_v3, %v508_v3 }
 0x1be   :  { %561 = vst.msk [vmem:[%s1463_s4 + $0x2c] sm:$0xf] %vm549_vm5, %v544_v0  ;;  %v535_v33 = vpack.c.bf16 %v498_v4, %v498_v4  ;;  %602 = vrot.lane.b32.xlu0 %v543_v58, %s717_s8 }
 0x1bf   :  { %556 = vst.msk [vmem:[%s1463_s4 + $0x18] sm:$0xf] %vm549_vm5, %v539_v45 }
 0x1c0   :  { %552 = vst.msk [vmem:[%s1463_s4 + $0x8] sm:$0xf] %vm549_vm5, %v535_v33  ;;  %586 = vrot.lane.b32.xlu1 %v535_v33, %s717_s8 }
 0x1c1   :  { %v530_v30 = vpop.f32.mrf.mxu3 }
 0x1c2   :  { %v548_v36 = vpack.c.bf16 %v530_v30, %v530_v30 }
 0x1c4   :  { %565 = vst.msk [vmem:[%s1463_s4 + $0x3c] sm:$0xf] %vm549_vm5, %v548_v36  ;;  %v510_v19 = vpop.f32.mrf.mxu1 }
 0x1c5   :  { %v500_v6 = vpop.f32.mrf.mxu0  ;;  %v540_v7 = vpack.c.bf16 %v510_v19, %v510_v19 }
 0x1c6   :  { %v536_v35 = vpack.c.bf16 %v500_v6, %v500_v6 }
 0x1c7   :  { %557 = vst.msk [vmem:[%s1463_s4 + $0x1c] sm:$0xf] %vm549_vm5, %v540_v7  ;;  %596 = vrot.lane.b32.xlu0 %v540_v7, %s717_s8 }
 0x1c8   :  { %553 = vst.msk [vmem:[%s1463_s4 + $0xc] sm:$0xf] %vm549_vm5, %v536_v35  ;;  %594 = vrot.lane.b32.xlu1 %v539_v45, %s717_s8  ;;  %588 = vrot.lane.b32.xlu2 %v536_v35, %s717_s8 }
 0x1cf   :  { %608 = vrot.lane.b32.xlu0 %v546_v26, %s717_s8 }
 0x1d0   :  { %612 = vrot.lane.b32.xlu1 %v548_v36, %s717_s8  ;;  %604 = vrot.lane.b32.xlu2 %v544_v0, %s717_s8 }
 0x1d8   :  { %610 = vrot.lane.b32.xlu2 %v547_v12, %s717_s8 }
 0x207   :  { %v583_v62 = vpop.permute.xlu2 %582 }
 0x208   :  { %630 = vst.msk [vmem:[%s1464_s5] sm:$0xf] %vm549_vm5, %v583_v62 }
 0x20f   :  { %v599_v8 = vpop.permute.xlu2 %598 }
 0x210   :  { %638 = vst.msk [vmem:[%s1464_s5 + $0x20] sm:$0xf] %vm549_vm5, %v599_v8 }
 0x217   :  { %v593_v9 = vpop.permute.xlu2 %592 }
 0x218   :  { %635 = vst.msk [vmem:[%s1464_s5 + $0x14] sm:$0xf] %vm549_vm5, %v593_v9 }
 0x21a   :  { %v607_v63 = vpop.permute.xlu1 %606 }
 0x21b   :  { %642 = vst.msk [vmem:[%s1464_s5 + $0x30] sm:$0xf] %vm549_vm5, %v607_v63 }
 0x220   :  { %v591_v14 = vpop.permute.xlu0 %590 }
 0x221   :  { %634 = vst.msk [vmem:[%s1464_s5 + $0x10] sm:$0xf] %vm549_vm5, %v591_v14 }
 0x222   :  { %v601_v38 = vpop.permute.xlu1 %600  ;;  %v589_v34 = vpop.permute.xlu2 %588 }
 0x223   :  { %639 = vst.msk [vmem:[%s1464_s5 + $0x24] sm:$0xf] %vm549_vm5, %v601_v38 }
 0x224   :  { %633 = vst.msk [vmem:[%s1464_s5 + $0xc] sm:$0xf] %vm549_vm5, %v589_v34 }
 0x228   :  { %v585_v28 = vpop.permute.xlu0 %584 }
 0x229   :  { %631 = vst.msk [vmem:[%s1464_s5 + $0x4] sm:$0xf] %vm549_vm5, %v585_v28 }
 0x22a   :  { %v605_v39 = vpop.permute.xlu2 %604 }
 0x22b   :  { %641 = vst.msk [vmem:[%s1464_s5 + $0x2c] sm:$0xf] %vm549_vm5, %v605_v39 }
 0x230   :  { %v603_v44 = vpop.permute.xlu0 %602 }
 0x231   :  { %640 = vst.msk [vmem:[%s1464_s5 + $0x28] sm:$0xf] %vm549_vm5, %v603_v44 }
 0x232   :  { %v587_v27 = vpop.permute.xlu1 %586  ;;  %v611_v29 = vpop.permute.xlu2 %610 }
 0x233   :  { %632 = vst.msk [vmem:[%s1464_s5 + $0x8] sm:$0xf] %vm549_vm5, %v587_v27 }
 0x234   :  { %644 = vst.msk [vmem:[%s1464_s5 + $0x38] sm:$0xf] %vm549_vm5, %v611_v29 }
 0x239   :  { %v597_v23 = vpop.permute.xlu0 %596 }
 0x23a   :  { %637 = vst.msk [vmem:[%s1464_s5 + $0x1c] sm:$0xf] %vm549_vm5, %v597_v23  ;;  %v595_v20 = vpop.permute.xlu1 %594 }
 0x23b   :  { %636 = vst.msk [vmem:[%s1464_s5 + $0x18] sm:$0xf] %vm549_vm5, %v595_v20 }
 0x241   :  { %v609_v17 = vpop.permute.xlu0 %608 }
 0x242   :  { %643 = vst.msk [vmem:[%s1464_s5 + $0x34] sm:$0xf] %vm549_vm5, %v609_v17  ;;  %v613_v41 = vpop.permute.xlu1 %612 }
 0x243   :  { %645 = vst.msk [vmem:[%s1464_s5 + $0x3c] sm:$0xf] %vm549_vm5, %v613_v41 }

</bundles_post_ra>
